<compile_context>
chip_gen: v5e
topology: v5e:2x2
jax: 0.10.0
libtpu: 0.0.40
codegen_flags: <defaults>
</compile_context>

<pallas_src>
import functools

import jax
import jax.numpy as jnp
from jax.experimental import pallas as pl
from jax.experimental.pallas import tpu as pltpu


def _round_up(x: int, m: int) -> int:
    return ((x + m - 1) // m) * m


def _ae_kernel(x_ref, w_enc_ref, b_enc_ref, w_dec_ref, b_dec_ref,
               z_ref, recon_ref):
    # x_ref:     (TM, D_in)           native dtype
    # w_enc_ref: (D_in, D_lat)        native dtype (resident)
    # b_enc_ref: (1, D_lat)           native dtype (resident)
    # w_dec_ref: (D_lat, D_in)        native dtype (resident)
    # b_dec_ref: (1, D_in)            native dtype (resident)
    x = x_ref[...]

    # Encoder linear: f32 accumulation on the MXU, native-dtype operands.
    z_acc = jnp.dot(x, w_enc_ref[...], preferred_element_type=jnp.float32)
    z_acc = z_acc + b_enc_ref[...].astype(jnp.float32)
    z_ref[...] = z_acc.astype(z_ref.dtype)

    # Decoder linear on the (rounded) z, matching what is returned as `z`.
    recon = jnp.dot(z_acc.astype(x.dtype), w_dec_ref[...],
                    preferred_element_type=jnp.float32)
    recon = recon + b_dec_ref[...].astype(jnp.float32)
    recon_ref[...] = recon.astype(recon_ref.dtype)


@functools.partial(jax.jit, static_argnames=("tm",))
def hwm_ae_test_forward(x, w_enc, b_enc, w_dec, b_dec, *, tm=512):
    """x: (batch, seq, input_dim). Weights stored as (in, out) = torch W.T.

    Returns (recon_obs, recon_act, z) matching HwmAETest.forward.
    """
    batch, seq, input_dim = x.shape
    latent_dim = w_enc.shape[1]
    dtype = x.dtype
    itemsize = jnp.dtype(dtype).itemsize

    m = batch * seq
    # Lane-dense padded feature dims (multiples of 128).
    d_in = _round_up(input_dim, 128)
    d_lat = _round_up(latent_dim, 128)
    # Row padding: multiple of 16 covers f32 (8) and bf16 (16) sublane tiling.
    m_rows = _round_up(m, 16)
    tm = min(tm, m_rows)
    m_pad = _round_up(m_rows, tm)

    # Zero-pad operands. Zero pad rows/cols contribute nothing, so the valid
    # region of the outputs is exact.
    x2d = jnp.zeros((m_pad, d_in), dtype).at[:m, :input_dim].set(
        x.reshape(m, input_dim))
    w_enc_p = jnp.zeros((d_in, d_lat), w_enc.dtype).at[:input_dim, :latent_dim].set(w_enc)
    b_enc_p = jnp.zeros((1, d_lat), b_enc.dtype).at[:, :latent_dim].set(
        b_enc.reshape(1, latent_dim))
    w_dec_p = jnp.zeros((d_lat, d_in), w_dec.dtype).at[:latent_dim, :input_dim].set(w_dec)
    b_dec_p = jnp.zeros((1, d_in), b_dec.dtype).at[:, :input_dim].set(
        b_dec.reshape(1, input_dim))

    grid = (pl.cdiv(m_pad, tm),)

    tiled = lambda shape: pl.BlockSpec(shape, lambda i: (0, 0))  # resident
    moving = lambda rows, cols: pl.BlockSpec((rows, cols), lambda i: (i, 0))

    flops = 2 * m_pad * d_in * d_lat * 2  # encoder + decoder matmuls
    bytes_accessed = itemsize * (
        m_pad * d_in            # read x
        + d_in * d_lat * 2      # both weight matrices
        + d_lat + d_in          # biases
        + m_pad * d_lat         # write z
        + m_pad * d_in)         # write recon

    z2d, recon2d = pl.pallas_call(
        _ae_kernel,
        out_shape=(
            jax.ShapeDtypeStruct((m_pad, d_lat), dtype),
            jax.ShapeDtypeStruct((m_pad, d_in), dtype),
        ),
        grid=grid,
        in_specs=[
            moving(tm, d_in),            # x tile
            tiled((d_in, d_lat)),        # w_enc (resident)
            tiled((1, d_lat)),           # b_enc (resident)
            tiled((d_lat, d_in)),        # w_dec (resident)
            tiled((1, d_in)),            # b_dec (resident)
        ],
        out_specs=(
            moving(tm, d_lat),           # z tile (lane-dense)
            moving(tm, d_in),            # recon tile (lane-dense)
        ),
        compiler_params=pltpu.CompilerParams(
            dimension_semantics=("parallel",)),
        cost_estimate=pl.CostEstimate(
            flops=flops, transcendentals=0, bytes_accessed=bytes_accessed),
    )(x2d, w_enc_p, b_enc_p, w_dec_p, b_dec_p)

    z = z2d[:m, :latent_dim].reshape(batch, seq, latent_dim)
    recon_obs = recon2d[:m, :input_dim].reshape(batch, seq, input_dim)
    recon_act = recon_obs  # TestDecoder returns (out, out)
    return recon_obs, recon_act, z


def init_params(key, input_dim, latent_dim, dtype=jnp.float32):
    """Deterministic init mimicking nn.Linear's U(-1/sqrt(fan_in), 1/sqrt(fan_in)).
    Weights stored as (in_features, out_features), i.e. PyTorch weight.T."""
    k1, k2, k3, k4 = jax.random.split(key, 4)
    lim_e = 1.0 / float(input_dim) ** 0.5
    lim_d = 1.0 / float(latent_dim) ** 0.5
    w_enc = jax.random.uniform(k1, (input_dim, latent_dim), dtype, -lim_e, lim_e)
    b_enc = jax.random.uniform(k2, (latent_dim,), dtype, -lim_e, lim_e)
    w_dec = jax.random.uniform(k3, (latent_dim, input_dim), dtype, -lim_d, lim_d)
    b_dec = jax.random.uniform(k4, (input_dim,), dtype, -lim_d, lim_d)
    return w_enc, b_enc, w_dec, b_dec


if __name__ == "__main__":
    # Small shapes consistent with the module; hidden_dim/obs_dim/act_dim are
    # unused by the forward pass.
    batch, seq = 2, 8
    input_dim, latent_dim = 32, 16

    key = jax.random.PRNGKey(0)
    kx, kp = jax.random.split(key)
    x = jax.random.normal(kx, (batch, seq, input_dim), jnp.float32)
    w_enc, b_enc, w_dec, b_dec = init_params(kp, input_dim, latent_dim)

    recon_obs, recon_act, z = hwm_ae_test_forward(x, w_enc, b_enc, w_dec, b_dec)
    jax.block_until_ready((recon_obs, recon_act, z))

    # Reference check in plain JAX.
    z_ref = x @ w_enc + b_enc
    recon_ref = z_ref @ w_dec + b_dec
    assert jnp.allclose(z, z_ref, atol=1e-5, rtol=1e-5)
    assert jnp.allclose(recon_obs, recon_ref, atol=1e-5, rtol=1e-5)
    assert jnp.allclose(recon_act, recon_ref, atol=1e-5, rtol=1e-5)

    print("KERNEL_OK")
</pallas_src>

<mosaic_0001>
module attributes {stable_mosaic.version = 11 : i64} {
  func.func @_ae_kernel(%arg0: i32, %arg1: memref<16x128xf32, #tpu.memory_space<vmem>>, %arg2: memref<128x128xf32, #tpu.memory_space<vmem>>, %arg3: memref<1x128xf32, #tpu.memory_space<vmem>>, %arg4: memref<128x128xf32, #tpu.memory_space<vmem>>, %arg5: memref<1x128xf32, #tpu.memory_space<vmem>>, %arg6: memref<16x128xf32, #tpu.memory_space<vmem>>, %arg7: memref<16x128xf32, #tpu.memory_space<vmem>>) attributes {dimension_semantics = [#tpu.dimension_semantics<parallel>], iteration_bounds = array<i64: 1>, scalar_prefetch = 0 : i64, scratch_operands = 0 : i64, tpu.core_type = #tpu.core_type<tc>, window_params = [{transform_indices = @transform_0, window_bounds = array<i64: 16, 128>}, {pipeline_mode = #tpu.pipeline_mode<synchronous>, transform_indices = @transform_1, window_bounds = array<i64: 128, 128>}, {pipeline_mode = #tpu.pipeline_mode<synchronous>, transform_indices = @transform_2, window_bounds = array<i64: 1, 128>}, {pipeline_mode = #tpu.pipeline_mode<synchronous>, transform_indices = @transform_3, window_bounds = array<i64: 128, 128>}, {pipeline_mode = #tpu.pipeline_mode<synchronous>, transform_indices = @transform_4, window_bounds = array<i64: 1, 128>}, {transform_indices = @transform_5, window_bounds = array<i64: 16, 128>}, {transform_indices = @transform_6, window_bounds = array<i64: 16, 128>}]} {
    %c0 = arith.constant 0 : index
    %c0_0 = arith.constant 0 : index
    %0 = vector.load %arg1[%c0, %c0_0] : memref<16x128xf32, #tpu.memory_space<vmem>>, vector<16x128xf32>
    %c0_1 = arith.constant 0 : index
    %c0_2 = arith.constant 0 : index
    %1 = vector.load %arg2[%c0_1, %c0_2] : memref<128x128xf32, #tpu.memory_space<vmem>>, vector<128x128xf32>
    %cst = arith.constant dense<0.000000e+00> : vector<16x128xf32>
    %2 = tpu.matmul %0, %1, %cst {dimension_numbers = #tpu.dot_dimension_numbers<[1], [0], [0], [1], [0, 0, 1, 1], [], []>} : vector<16x128xf32>, vector<128x128xf32>, vector<16x128xf32> -> vector<16x128xf32>
    %c0_3 = arith.constant 0 : index
    %c0_4 = arith.constant 0 : index
    %3 = vector.load %arg3[%c0_3, %c0_4] : memref<1x128xf32, #tpu.memory_space<vmem>>, vector<1x128xf32>
    %4 = vector.broadcast %3 : vector<1x128xf32> to vector<16x128xf32>
    %5 = arith.addf %2, %4 : vector<16x128xf32>
    %c0_5 = arith.constant 0 : index
    %c0_6 = arith.constant 0 : index
    %6 = vector.load %arg6[%c0_5, %c0_6] : memref<16x128xf32, #tpu.memory_space<vmem>>, vector<16x128xf32>
    tpu.vector_store %arg6[%c0_5, %c0_6], %5 {strides = array<i32>} : memref<16x128xf32, #tpu.memory_space<vmem>>, vector<16x128xf32>,
    %c0_7 = arith.constant 0 : index
    %c0_8 = arith.constant 0 : index
    %7 = vector.load %arg4[%c0_7, %c0_8] : memref<128x128xf32, #tpu.memory_space<vmem>>, vector<128x128xf32>
    %cst_9 = arith.constant dense<0.000000e+00> : vector<16x128xf32>
    %8 = tpu.matmul %5, %7, %cst_9 {dimension_numbers = #tpu.dot_dimension_numbers<[1], [0], [0], [1], [0, 0, 1, 1], [], []>} : vector<16x128xf32>, vector<128x128xf32>, vector<16x128xf32> -> vector<16x128xf32>
    %c0_10 = arith.constant 0 : index
    %c0_11 = arith.constant 0 : index
    %9 = vector.load %arg5[%c0_10, %c0_11] : memref<1x128xf32, #tpu.memory_space<vmem>>, vector<1x128xf32>
    %10 = vector.broadcast %9 : vector<1x128xf32> to vector<16x128xf32>
    %11 = arith.addf %8, %10 : vector<16x128xf32>
    %c0_12 = arith.constant 0 : index
    %c0_13 = arith.constant 0 : index
    %12 = vector.load %arg7[%c0_12, %c0_13] : memref<16x128xf32, #tpu.memory_space<vmem>>, vector<16x128xf32>
    tpu.vector_store %arg7[%c0_12, %c0_13], %11 {strides = array<i32>} : memref<16x128xf32, #tpu.memory_space<vmem>>, vector<16x128xf32>,
    return
  }
  func.func @transform_0(%arg0: i32) -> (i32, i32) {
    %c0_i32 = arith.constant 0 : i32
    %c0_i32_0 = arith.constant 0 : i32
    return %arg0, %c0_i32 : i32, i32
  }
  func.func @transform_1(%arg0: i32) -> (i32, i32) {
    %c0_i32 = arith.constant 0 : i32
    %c0_i32_0 = arith.constant 0 : i32
    %c0_i32_1 = arith.constant 0 : i32
    return %c0_i32, %c0_i32_0 : i32, i32
  }
  func.func @transform_2(%arg0: i32) -> (i32, i32) {
    %c0_i32 = arith.constant 0 : i32
    %c0_i32_0 = arith.constant 0 : i32
    %c0_i32_1 = arith.constant 0 : i32
    return %c0_i32, %c0_i32_0 : i32, i32
  }
  func.func @transform_3(%arg0: i32) -> (i32, i32) {
    %c0_i32 = arith.constant 0 : i32
    %c0_i32_0 = arith.constant 0 : i32
    %c0_i32_1 = arith.constant 0 : i32
    return %c0_i32, %c0_i32_0 : i32, i32
  }
  func.func @transform_4(%arg0: i32) -> (i32, i32) {
    %c0_i32 = arith.constant 0 : i32
    %c0_i32_0 = arith.constant 0 : i32
    %c0_i32_1 = arith.constant 0 : i32
    return %c0_i32, %c0_i32_0 : i32, i32
  }
  func.func @transform_5(%arg0: i32) -> (i32, i32) {
    %c0_i32 = arith.constant 0 : i32
    %c0_i32_0 = arith.constant 0 : i32
    return %arg0, %c0_i32 : i32, i32
  }
  func.func @transform_6(%arg0: i32) -> (i32, i32) {
    %c0_i32 = arith.constant 0 : i32
    %c0_i32_0 = arith.constant 0 : i32
    return %arg0, %c0_i32 : i32, i32
  }
}

</mosaic_0001>

<bundles_post_ra>
// kernel: hwm_ae_test_forward.1
= control target key start
LH: loop header
LB: loop body
LE: loop exit
PB: predicated region body
PF: predicated region fallthrough
CT: control target
= control target key end

     0   :  { %s311_s1 = inlined_call_operand.vmem [shape: f32[128,128], index: 1, kind: input, shape index: {}]   ;;  %s312_s3 = inlined_call_operand.vmem [shape: f32[128,128], index: 3, kind: input, shape index: {}]   ;;  %s313_s2 = inlined_call_operand.vmem [shape: f32[1,128], index: 2, kind: input, shape index: {}]   ;;  %s314_s0 = inlined_call_operand.vmem [shape: f32[16,128], index: 0, kind: input, shape index: {}]   ;;  %s315_s4 = inlined_call_operand.vmem [shape: f32[1,128], index: 4, kind: input, shape index: {}]   ;;  %s316_s5 = inlined_call_operand.vmem [shape: f32[16,128], index: 5, kind: output, shape index: {0}]   ;;  %s317_s6 = inlined_call_operand.vmem [shape: f32[16,128], index: 6, kind: output, shape index: {1}]  }
   0x1   :  { %v39_v0 = vld [vmem:[%s311_s1 + $0x78] sm:$0xff]  ;;  %v38_v1 = vld [vmem:[%s311_s1 + $0x70] sm:$0xff]  ;;  %v37_v2 = vld [vmem:[%s311_s1 + $0x68] sm:$0xff] }
   0x2   :  { %122 = vmatpush.msra.mxu2 %v39_v0  ;;  %44 = vmatpush.msra.mxu0 %v39_v0  ;;  %v36_v3 = vld [vmem:[%s311_s1 + $0x60] sm:$0xff]  ;;  %v35_v4 = vld [vmem:[%s311_s1 + $0x58] sm:$0xff]  ;;  %v83_v6 = vld [vmem:[%s312_s3 + $0x70] sm:$0xff] }
   0x3   :  { %v84_v5 = vld [vmem:[%s312_s3 + $0x78] sm:$0xff]  ;;  %v34_v7 = vld [vmem:[%s311_s1 + $0x50] sm:$0xff]  ;;  %v82_v8 = vld [vmem:[%s312_s3 + $0x68] sm:$0xff] }
   0x4   :  { %123 = vmatpush.msra.mxu2 %v38_v1  ;;  %45 = vmatpush.msra.mxu0 %v38_v1  ;;  %v33_v9 = vld [vmem:[%s311_s1 + $0x48] sm:$0xff]  ;;  %v81_v10 = vld [vmem:[%s312_s3 + $0x60] sm:$0xff]  ;;  %v80_v12 = vld [vmem:[%s312_s3 + $0x58] sm:$0xff] }
   0x5   :  { %138 = vmatpush.msra.mxu3 %v84_v5  ;;  %89 = vmatpush.msra.mxu1 %v84_v5  ;;  %v32_v11 = vld [vmem:[%s311_s1 + $0x40] sm:$0xff]  ;;  %v31_v13 = vld [vmem:[%s311_s1 + $0x38] sm:$0xff]  ;;  %v79_v14 = vld [vmem:[%s312_s3 + $0x50] sm:$0xff] }
   0x6   :  { %124 = vmatpush.msra.mxu2 %v37_v2  ;;  %46 = vmatpush.msra.mxu0 %v37_v2  ;;  %v30_v15 = vld [vmem:[%s311_s1 + $0x30] sm:$0xff]  ;;  %v78_v16 = vld [vmem:[%s312_s3 + $0x48] sm:$0xff]  ;;  %v77_v18 = vld [vmem:[%s312_s3 + $0x40] sm:$0xff] }
   0x7   :  { %139 = vmatpush.msra.mxu3 %v83_v6  ;;  %90 = vmatpush.msra.mxu1 %v83_v6  ;;  %v29_v17 = vld [vmem:[%s311_s1 + $0x28] sm:$0xff]  ;;  %v28_v19 = vld [vmem:[%s311_s1 + $0x20] sm:$0xff]  ;;  %v76_v20 = vld [vmem:[%s312_s3 + $0x38] sm:$0xff] }
   0x8   :  { %125 = vmatpush.msra.mxu2 %v36_v3  ;;  %47 = vmatpush.msra.mxu0 %v36_v3  ;;  %v27_v21 = vld [vmem:[%s311_s1 + $0x18] sm:$0xff]  ;;  %v75_v22 = vld [vmem:[%s312_s3 + $0x30] sm:$0xff]  ;;  %v74_v24 = vld [vmem:[%s312_s3 + $0x28] sm:$0xff] }
   0x9   :  { %140 = vmatpush.msra.mxu3 %v82_v8  ;;  %91 = vmatpush.msra.mxu1 %v82_v8  ;;  %v26_v23 = vld [vmem:[%s311_s1 + $0x10] sm:$0xff]  ;;  %v25_v25 = vld [vmem:[%s311_s1 + $0x8] sm:$0xff]  ;;  %v73_v26 = vld [vmem:[%s312_s3 + $0x20] sm:$0xff] }
   0xa   :  { %126 = vmatpush.msra.mxu2 %v35_v4  ;;  %48 = vmatpush.msra.mxu0 %v35_v4  ;;  %v24_v27 = vld [vmem:[%s311_s1] sm:$0xff]  ;;  %v23_v28 = vld [vmem:[%s314_s0 + $0x8] sm:$0xff]  ;;  %v72_v30 = vld [vmem:[%s312_s3 + $0x18] sm:$0xff] }
   0xb   :  { %141 = vmatpush.msra.mxu3 %v81_v10  ;;  %92 = vmatpush.msra.mxu1 %v81_v10  ;;  %v22_v29 = vld [vmem:[%s314_s0] sm:$0xff]  ;;  %v71_v31 = vld [vmem:[%s312_s3 + $0x10] sm:$0xff]  ;;  %v70_v32 = vld [vmem:[%s312_s3 + $0x8] sm:$0xff] }
   0xc   :  { %127 = vmatpush.msra.mxu2 %v34_v7  ;;  %49 = vmatpush.msra.mxu0 %v34_v7  ;;  %v69_v33 = vld [vmem:[%s312_s3] sm:$0xff] }
   0xd   :  { %142 = vmatpush.msra.mxu3 %v80_v12  ;;  %93 = vmatpush.msra.mxu1 %v80_v12  ;;  %v154_v34 = vld [vmem:[%s313_s2] ss:$0 sm:$0xff] }
   0xe   :  { %128 = vmatpush.msra.mxu2 %v33_v9  ;;  %50 = vmatpush.msra.mxu0 %v33_v9  ;;  %v155_v39 = vld [vmem:[%s315_s4] ss:$0 sm:$0xff] }
   0xf   :  { %143 = vmatpush.msra.mxu3 %v79_v14  ;;  %94 = vmatpush.msra.mxu1 %v79_v14 }
  0x10   :  { %129 = vmatpush.msra.mxu2 %v32_v11  ;;  %51 = vmatpush.msra.mxu0 %v32_v11 }
  0x11   :  { %144 = vmatpush.msra.mxu3 %v78_v16  ;;  %95 = vmatpush.msra.mxu1 %v78_v16 }
  0x12   :  { %130 = vmatpush.msra.mxu2 %v31_v13  ;;  %52 = vmatpush.msra.mxu0 %v31_v13 }
  0x13   :  { %145 = vmatpush.msra.mxu3 %v77_v18  ;;  %96 = vmatpush.msra.mxu1 %v77_v18 }
  0x14   :  { %131 = vmatpush.msra.mxu2 %v30_v15  ;;  %53 = vmatpush.msra.mxu0 %v30_v15 }
  0x15   :  { %146 = vmatpush.msra.mxu3 %v76_v20  ;;  %97 = vmatpush.msra.mxu1 %v76_v20 }
  0x16   :  { %132 = vmatpush.msra.mxu2 %v29_v17  ;;  %54 = vmatpush.msra.mxu0 %v29_v17 }
  0x17   :  { %147 = vmatpush.msra.mxu3 %v75_v22  ;;  %98 = vmatpush.msra.mxu1 %v75_v22 }
  0x18   :  { %133 = vmatpush.msra.mxu2 %v28_v19  ;;  %55 = vmatpush.msra.mxu0 %v28_v19 }
  0x19   :  { %148 = vmatpush.msra.mxu3 %v74_v24  ;;  %99 = vmatpush.msra.mxu1 %v74_v24 }
  0x1a   :  { %134 = vmatpush.msra.mxu2 %v27_v21  ;;  %56 = vmatpush.msra.mxu0 %v27_v21 }
  0x1b   :  { %149 = vmatpush.msra.mxu3 %v73_v26  ;;  %100 = vmatpush.msra.mxu1 %v73_v26 }
  0x1c   :  { %135 = vmatpush.msra.mxu2 %v26_v23  ;;  %57 = vmatpush.msra.mxu0 %v26_v23 }
  0x1d   :  { %150 = vmatpush.msra.mxu3 %v72_v30  ;;  %101 = vmatpush.msra.mxu1 %v72_v30 }
  0x1e   :  { %136 = vmatpush.msra.mxu2 %v25_v25  ;;  %58 = vmatpush.msra.mxu0 %v25_v25 }
  0x1f   :  { %151 = vmatpush.msra.mxu3 %v71_v31  ;;  %102 = vmatpush.msra.mxu1 %v71_v31 }
  0x20   :  { %137 = vmatpush.msra.mxu2 %v24_v27  ;;  %59 = vmatpush.msra.mxu0 %v24_v27 }
  0x21   :  { %63 = vmatmul.f32.vlgmr.msra.gmra.mxu2 %v23_v28  ;;  %60 = vmatmul.f32.vlgmr.msra.gmra.mxu0 %v22_v29 }
  0x22   :  { %152 = vmatpush.msra.mxu3 %v70_v32  ;;  %103 = vmatpush.msra.mxu1 %v70_v32 }
  0x24   :  { %153 = vmatpush.msra.mxu3 %v69_v33  ;;  %104 = vmatpush.msra.mxu1 %v69_v33 }
  0x9e   :  { %v61_v35 = vpop.f32.mrf.mxu0 }
  0x9f   :  { %v62_v36 = vadd.f32 %v154_v34, %v61_v35 }
  0xa1   :  { %67 = vst [vmem:[%s316_s5] sm:$0xff] %v62_v36  ;;  %105 = vmatmul.f32.vlgmr.msra.gmra.mxu1 %v62_v36 }
  0xa4   :  { %v64_v37 = vpop.f32.mrf.mxu2 }
  0xa5   :  { %v65_v38 = vadd.f32 %v154_v34, %v64_v37 }
  0xa7   :  { %68 = vst [vmem:[%s316_s5 + $0x8] sm:$0xff] %v65_v38  ;;  %108 = vmatmul.f32.vlgmr.msra.gmra.mxu3 %v65_v38 }
 0x11e   :  { %v106_v40 = vpop.f32.mrf.mxu1 }
 0x11f   :  { %v107_v41 = vadd.f32 %v155_v39, %v106_v40 }
 0x121   :  { %112 = vst [vmem:[%s317_s6] sm:$0xff] %v107_v41 }
 0x12a   :  { %v109_v42 = vpop.f32.mrf.mxu3 }
 0x12b   :  { %v110_v43 = vadd.f32 %v155_v39, %v109_v42 }
 0x12d   :  { %113 = vst [vmem:[%s317_s6 + $0x8] sm:$0xff] %v110_v43 }

</bundles_post_ra>
